<compile_context>
chip_gen: v7x
topology: tpu7x:2x2x1
jax: 0.10.0
libtpu: 0.0.40
codegen_flags: <defaults>
</compile_context>

<pallas_src>
import jax
import jax.numpy as jnp
from jax.experimental import pallas as pl
from jax.experimental.pallas import tpu as pltpu

NUM_LAYERS = 7
PAD = 128            # lane-dense padded feature width
BIAS_LANE = PAD - 1  # constant-1 lane that carries the folded biases


def _round_up(x, m):
    return ((x + m - 1) // m) * m


def biometric_kernel(x_ref, w_ref, out_ref):
    """x_ref: (TB, PAD) bf16, w_ref: (7, PAD, PAD) bf16, out_ref: (TB, PAD) f32."""
    h = x_ref[...]                                        # bf16 activations
    for k in range(NUM_LAYERS - 1):                       # static unroll: 6x Linear+ReLU
        acc = jnp.dot(h, w_ref[k], preferred_element_type=jnp.float32)
        h = jnp.maximum(acc, 0.0).astype(jnp.bfloat16)    # ReLU on f32 acc, bf16 for next MXU op
    logits = jnp.dot(h, w_ref[NUM_LAYERS - 1],
                     preferred_element_type=jnp.float32)
    out_ref[...] = jax.nn.sigmoid(logits).astype(out_ref.dtype)


def pack_params(params):
    """Zero-pad all layer weights into one bf16 slab with each bias folded into
    row BIAS_LANE (paired with the constant-1 input lane)."""
    w_packed = jnp.zeros((NUM_LAYERS, PAD, PAD), jnp.float32)
    for k, (w, b) in enumerate(params):
        fin, fout = w.shape
        assert fin <= PAD - 1 and fout <= PAD - 1, "feature dims must be < 128"
        w_packed = w_packed.at[k, :fin, :fout].set(w.astype(jnp.float32))
        w_packed = w_packed.at[k, BIAS_LANE, :fout].set(b.astype(jnp.float32))
        w_packed = w_packed.at[k, BIAS_LANE, BIAS_LANE].set(1.0)  # keep the 1-lane alive
    return w_packed.astype(jnp.bfloat16)


def _choose_batch_tile(batch, requested):
    """Largest sensible, sublane/lane-aligned batch tile."""
    b8 = _round_up(batch, 8)
    tb = min(_round_up(max(int(requested), 8), 8), b8)    # never exceed (rounded) batch
    if tb >= 128:
        tb = (tb // 128) * 128                            # keep big tiles 128-aligned
    if tb >= b8 and b8 >= 16:                             # one tile would cover the batch:
        tb = _round_up(b8 // 2, 8)                        # split so both v7x TCs get work
    return tb


def biometric_identifier(x, params, *, batch_tile=256):
    """x: (B, input_size) float. params: list of (W, b) with W stored (in, out)."""
    batch, input_size = x.shape
    assert input_size <= PAD - 1
    embed_size = params[-1][0].shape[1]

    tb = _choose_batch_tile(batch, batch_tile)
    b_pad = _round_up(batch, tb)

    # Lane-dense padded input: zeros up to lane 126, constant 1.0 in lane 127
    # (the bias lane).  jnp.pad only touches the pad region (no zeros+scatter slab).
    x_p = jnp.pad(x.astype(jnp.bfloat16),
                  ((0, b_pad - batch), (0, BIAS_LANE - input_size)))
    x_p = jnp.pad(x_p, ((0, 0), (0, 1)), constant_values=1.0)

    w_packed = pack_params(params)

    # Scoped-VMEM estimate: double-buffered x (bf16) / out (f32) tiles plus the
    # double-buffered resident weight slab.
    vmem_bytes = 2 * tb * PAD * (2 + 4) + 2 * NUM_LAYERS * PAD * PAD * 2
    cp = {"dimension_semantics": ("parallel",)}
    if vmem_bytes > 12 * 1024 * 1024:   # only for very large tiles (v5e 16 MiB default limit)
        cp["vmem_limit_bytes"] = int(min(vmem_bytes + (4 << 20), 56 << 20))

    out = pl.pallas_call(
        biometric_kernel,
        out_shape=jax.ShapeDtypeStruct((b_pad, PAD), jnp.float32),
        grid=(b_pad // tb,),
        in_specs=[
            pl.BlockSpec((tb, PAD), lambda i: (i, 0)),                   # x tile (pipelined)
            pl.BlockSpec((NUM_LAYERS, PAD, PAD), lambda i: (0, 0, 0)),   # weights (resident)
        ],
        out_specs=pl.BlockSpec((tb, PAD), lambda i: (i, 0)),
        compiler_params=pltpu.CompilerParams(**cp),
    )(x_p, w_packed)

    # Drop batch padding and padded embedding lanes (sigmoid(0)=0.5 lives there).
    return out[:batch, :embed_size]


def init_params(key, input_size, hidden_size, embed_size):
    """Deterministic synthetic init (uniform, torch-Linear-like fan_in scaling)."""
    dims = ([(input_size, hidden_size)]
            + [(hidden_size, hidden_size)] * 5
            + [(hidden_size, embed_size)])
    params = []
    for (fan_in, fan_out) in dims:
        key, kw, kb = jax.random.split(key, 3)
        bound = 1.0 / (fan_in ** 0.5)
        w = jax.random.uniform(kw, (fan_in, fan_out), jnp.float32, -bound, bound)
        b = jax.random.uniform(kb, (fan_out,), jnp.float32, -bound, bound)
        params.append((w, b))
    return params


def reference_forward(x, params):
    h = x
    for i, (w, b) in enumerate(params):
        h = h @ w + b
        h = jnp.maximum(h, 0.0) if i < len(params) - 1 else jax.nn.sigmoid(h)
    return h


if __name__ == "__main__":
    key = jax.random.PRNGKey(0)
    batch, input_size, hidden_size, embed_size = 16, 16, 32, 8

    kx, kp = jax.random.split(key)
    x = jax.random.normal(kx, (batch, input_size), jnp.float32)
    params = init_params(kp, input_size, hidden_size, embed_size)

    out = biometric_identifier(x, params)        # at this size: tb=8, 2-tile grid
    out = jax.block_until_ready(out)

    ref = reference_forward(x, params)
    assert out.shape == (batch, embed_size)
    # bf16 MXU operands with f32 accumulation: relaxed tolerance vs f32 reference.
    assert jnp.allclose(out, ref, atol=2e-2, rtol=2e-2), "mismatch vs reference"

    print("KERNEL_OK")
</pallas_src>

<mosaic_0001>
module attributes {stable_mosaic.version = 11 : i64} {
  func.func @biometric_kernel(%arg0: i32, %arg1: memref<8x128xbf16, #tpu.memory_space<vmem>>, %arg2: memref<7x128x128xbf16, #tpu.memory_space<vmem>>, %arg3: memref<8x128xf32, #tpu.memory_space<vmem>>) attributes {dimension_semantics = [#tpu.dimension_semantics<parallel>], iteration_bounds = array<i64: 2>, scalar_prefetch = 0 : i64, scratch_operands = 0 : i64, tpu.core_type = #tpu.core_type<tc>, window_params = [{transform_indices = @transform_0, window_bounds = array<i64: 8, 128>}, {pipeline_mode = #tpu.pipeline_mode<synchronous>, transform_indices = @transform_1, window_bounds = array<i64: 7, 128, 128>}, {transform_indices = @transform_2, window_bounds = array<i64: 8, 128>}]} {
    %c0 = arith.constant 0 : index
    %c0_0 = arith.constant 0 : index
    %0 = vector.load %arg1[%c0, %c0_0] : memref<8x128xbf16, #tpu.memory_space<vmem>>, vector<8x128xbf16>
    %c0_1 = arith.constant 0 : index
    %c0_2 = arith.constant 0 : index
    %c0_3 = arith.constant 0 : index
    %1 = vector.load %arg2[%c0_1, %c0_2, %c0_3] : memref<7x128x128xbf16, #tpu.memory_space<vmem>>, vector<1x128x128xbf16>
    %2 = vector.shape_cast %1 : vector<1x128x128xbf16> to vector<128x128xbf16>
    %cst = arith.constant dense<0.000000e+00> : vector<8x128xf32>
    %3 = tpu.matmul %0, %2, %cst {dimension_numbers = #tpu.dot_dimension_numbers<[1], [0], [0], [1], [0, 0, 1, 1], [], []>} : vector<8x128xbf16>, vector<128x128xbf16>, vector<8x128xf32> -> vector<8x128xf32>
    %cst_4 = arith.constant 0.000000e+00 : f32
    %4 = vector.broadcast %cst_4 : f32 to vector<8x128xf32>
    %5 = arith.maximumf %3, %4 : vector<8x128xf32>
    %6 = arith.truncf %5 : vector<8x128xf32> to vector<8x128xbf16>
    %c1 = arith.constant 1 : index
    %c0_5 = arith.constant 0 : index
    %c0_6 = arith.constant 0 : index
    %7 = vector.load %arg2[%c1, %c0_5, %c0_6] : memref<7x128x128xbf16, #tpu.memory_space<vmem>>, vector<1x128x128xbf16>
    %8 = vector.shape_cast %7 : vector<1x128x128xbf16> to vector<128x128xbf16>
    %cst_7 = arith.constant dense<0.000000e+00> : vector<8x128xf32>
    %9 = tpu.matmul %6, %8, %cst_7 {dimension_numbers = #tpu.dot_dimension_numbers<[1], [0], [0], [1], [0, 0, 1, 1], [], []>} : vector<8x128xbf16>, vector<128x128xbf16>, vector<8x128xf32> -> vector<8x128xf32>
    %cst_8 = arith.constant 0.000000e+00 : f32
    %10 = vector.broadcast %cst_8 : f32 to vector<8x128xf32>
    %11 = arith.maximumf %9, %10 : vector<8x128xf32>
    %12 = arith.truncf %11 : vector<8x128xf32> to vector<8x128xbf16>
    %c2 = arith.constant 2 : index
    %c0_9 = arith.constant 0 : index
    %c0_10 = arith.constant 0 : index
    %13 = vector.load %arg2[%c2, %c0_9, %c0_10] : memref<7x128x128xbf16, #tpu.memory_space<vmem>>, vector<1x128x128xbf16>
    %14 = vector.shape_cast %13 : vector<1x128x128xbf16> to vector<128x128xbf16>
    %cst_11 = arith.constant dense<0.000000e+00> : vector<8x128xf32>
    %15 = tpu.matmul %12, %14, %cst_11 {dimension_numbers = #tpu.dot_dimension_numbers<[1], [0], [0], [1], [0, 0, 1, 1], [], []>} : vector<8x128xbf16>, vector<128x128xbf16>, vector<8x128xf32> -> vector<8x128xf32>
    %cst_12 = arith.constant 0.000000e+00 : f32
    %16 = vector.broadcast %cst_12 : f32 to vector<8x128xf32>
    %17 = arith.maximumf %15, %16 : vector<8x128xf32>
    %18 = arith.truncf %17 : vector<8x128xf32> to vector<8x128xbf16>
    %c3 = arith.constant 3 : index
    %c0_13 = arith.constant 0 : index
    %c0_14 = arith.constant 0 : index
    %19 = vector.load %arg2[%c3, %c0_13, %c0_14] : memref<7x128x128xbf16, #tpu.memory_space<vmem>>, vector<1x128x128xbf16>
    %20 = vector.shape_cast %19 : vector<1x128x128xbf16> to vector<128x128xbf16>
    %cst_15 = arith.constant dense<0.000000e+00> : vector<8x128xf32>
    %21 = tpu.matmul %18, %20, %cst_15 {dimension_numbers = #tpu.dot_dimension_numbers<[1], [0], [0], [1], [0, 0, 1, 1], [], []>} : vector<8x128xbf16>, vector<128x128xbf16>, vector<8x128xf32> -> vector<8x128xf32>
    %cst_16 = arith.constant 0.000000e+00 : f32
    %22 = vector.broadcast %cst_16 : f32 to vector<8x128xf32>
    %23 = arith.maximumf %21, %22 : vector<8x128xf32>
    %24 = arith.truncf %23 : vector<8x128xf32> to vector<8x128xbf16>
    %c4 = arith.constant 4 : index
    %c0_17 = arith.constant 0 : index
    %c0_18 = arith.constant 0 : index
    %25 = vector.load %arg2[%c4, %c0_17, %c0_18] : memref<7x128x128xbf16, #tpu.memory_space<vmem>>, vector<1x128x128xbf16>
    %26 = vector.shape_cast %25 : vector<1x128x128xbf16> to vector<128x128xbf16>
    %cst_19 = arith.constant dense<0.000000e+00> : vector<8x128xf32>
    %27 = tpu.matmul %24, %26, %cst_19 {dimension_numbers = #tpu.dot_dimension_numbers<[1], [0], [0], [1], [0, 0, 1, 1], [], []>} : vector<8x128xbf16>, vector<128x128xbf16>, vector<8x128xf32> -> vector<8x128xf32>
    %cst_20 = arith.constant 0.000000e+00 : f32
    %28 = vector.broadcast %cst_20 : f32 to vector<8x128xf32>
    %29 = arith.maximumf %27, %28 : vector<8x128xf32>
    %30 = arith.truncf %29 : vector<8x128xf32> to vector<8x128xbf16>
    %c5 = arith.constant 5 : index
    %c0_21 = arith.constant 0 : index
    %c0_22 = arith.constant 0 : index
    %31 = vector.load %arg2[%c5, %c0_21, %c0_22] : memref<7x128x128xbf16, #tpu.memory_space<vmem>>, vector<1x128x128xbf16>
    %32 = vector.shape_cast %31 : vector<1x128x128xbf16> to vector<128x128xbf16>
    %cst_23 = arith.constant dense<0.000000e+00> : vector<8x128xf32>
    %33 = tpu.matmul %30, %32, %cst_23 {dimension_numbers = #tpu.dot_dimension_numbers<[1], [0], [0], [1], [0, 0, 1, 1], [], []>} : vector<8x128xbf16>, vector<128x128xbf16>, vector<8x128xf32> -> vector<8x128xf32>
    %cst_24 = arith.constant 0.000000e+00 : f32
    %34 = vector.broadcast %cst_24 : f32 to vector<8x128xf32>
    %35 = arith.maximumf %33, %34 : vector<8x128xf32>
    %36 = arith.truncf %35 : vector<8x128xf32> to vector<8x128xbf16>
    %c6 = arith.constant 6 : index
    %c0_25 = arith.constant 0 : index
    %c0_26 = arith.constant 0 : index
    %37 = vector.load %arg2[%c6, %c0_25, %c0_26] : memref<7x128x128xbf16, #tpu.memory_space<vmem>>, vector<1x128x128xbf16>
    %38 = vector.shape_cast %37 : vector<1x128x128xbf16> to vector<128x128xbf16>
    %cst_27 = arith.constant dense<0.000000e+00> : vector<8x128xf32>
    %39 = tpu.matmul %36, %38, %cst_27 {dimension_numbers = #tpu.dot_dimension_numbers<[1], [0], [0], [1], [0, 0, 1, 1], [], []>} : vector<8x128xbf16>, vector<128x128xbf16>, vector<8x128xf32> -> vector<8x128xf32>
    %40 = arith.negf %39 : vector<8x128xf32>
    %41 = math.exp %40 : vector<8x128xf32>
    %cst_28 = arith.constant 1.000000e+00 : f32
    %42 = vector.broadcast %cst_28 : f32 to vector<8x128xf32>
    %43 = arith.addf %42, %41 : vector<8x128xf32>
    %44 = arith.divf %42, %43 : vector<8x128xf32>
    %c0_29 = arith.constant 0 : index
    %c0_30 = arith.constant 0 : index
    %45 = vector.load %arg3[%c0_29, %c0_30] : memref<8x128xf32, #tpu.memory_space<vmem>>, vector<8x128xf32>
    tpu.vector_store %arg3[%c0_29, %c0_30], %44 {strides = array<i32>} : memref<8x128xf32, #tpu.memory_space<vmem>>, vector<8x128xf32>,
    return
  }
  func.func @transform_0(%arg0: i32) -> (i32, i32) {
    %c0_i32 = arith.constant 0 : i32
    %c0_i32_0 = arith.constant 0 : i32
    return %arg0, %c0_i32 : i32, i32
  }
  func.func @transform_1(%arg0: i32) -> (i32, i32, i32) {
    %c0_i32 = arith.constant 0 : i32
    %c0_i32_0 = arith.constant 0 : i32
    %c0_i32_1 = arith.constant 0 : i32
    %c0_i32_2 = arith.constant 0 : i32
    return %c0_i32, %c0_i32_0, %c0_i32_1 : i32, i32, i32
  }
  func.func @transform_2(%arg0: i32) -> (i32, i32) {
    %c0_i32 = arith.constant 0 : i32
    %c0_i32_0 = arith.constant 0 : i32
    return %arg0, %c0_i32 : i32, i32
  }
}

</mosaic_0001>

<bundles_post_ra>
// kernel: tpu_custom_call.1
= control target key start
LH: loop header
LB: loop body
LE: loop exit
PB: predicated region body
PF: predicated region fallthrough
CT: control target
= control target key end

     0   :  { %7 = vsyncpa [#allocation3], 0  ;;  %s1840_s0 = inlined_call_operand.hbm [shape: bf16[16,128], index: 0, kind: input, shape index: {}]   ;;  %s1841_s1 = inlined_call_operand.hbm [shape: bf16[7,128,128], index: 1, kind: input, shape index: {}]   ;;  %s1842_s2 = inlined_call_operand.hbm [shape: f32[16,128], index: 2, kind: output, shape index: {}]  }
   0x1   :  { %9 = vsyncpa [#allocation3 + $0x1], 0 }
   0x2   :  { %10 = vsyncpa [#allocation6], 0 }
   0x3   :  { %11 = vsyncpa [#allocation4], 0 }
   0x4   :  { %13 = vsyncpa [#allocation4 + $0x1], 0  ;;  %s1570_s9 = smov 0   ;;  %s1572_s10 = smov 0  }
   0x5   :  { %s1574_s11 = smov 0   ;;  %s1576_s12 = smov 0  }
   0x6 LB: > { %s1591_s13 = sadd.s32 4294967295, %s1546_s12   ;;  %s1023_s14 = sadd.s32 4294967294, %s1546_s12   ;;  %s1546_s12 = sphi %s1576_s12, %s1862_s12   ;;  %s1542_s11 = sphi %s1574_s11, %s1861_s11   ;;  %s1538_s10 = sphi %s1572_s10, %s1860_s10   ;;  %s1534_s9 = sphi %s1570_s9, %s1859_s9  }
   0x7   : > { %p39_p0 = scmp.ne.s32.totalorder %s1538_s10, %s1534_s9  ;;  %p1843_p1 = scmp.eq.s32.totalorder %s1591_s13, 0 }
   0x8   : > { %p90_p3 = scmp.eq.s32.totalorder %s1023_s14, 1  ;;  %p1024_p5 = scmp.ge.s32.totalorder %s1546_s12, 1 }
   0x9   : > { %p1600_p4 = por %p1843_p1, %p39_p0  ;;  %p97_p7 = scmp.lt.s32.totalorder %s1546_s12, 3 }
   0xa   : > { %p1605_p6 = por %p90_p3, %p39_p0  ;;  %s1548_s18 = smov [#allocation5]  }
   0xb   : > { %s1846_s15 = scalar_select %p1600_p4, 1, 0 }
   0xc   : > { %s1847_s16 = scalar_select %p1605_p6, 1, 0 }
   0xd   : > { %p1610_p8 = pnand %p1024_p5, %p97_p7  ;;  %s109_s19 = sshll.u32 %s1548_s18, 4  ;;  %s1614_s19 = int_to_ptr.vmem [resolvable:$true] %s109_s19 }
   0xe   : > { %s1626_s21 = sadd.s32 1, %s1546_s12   ;;  %s26_s22 = sadd.s32 1, %s1542_s11 }
   0xf   : > { %s1848_s17 = scalar_select %p1610_p8, 1, 0 }
  0x10   : > { %p1305_p9 = pneg %p1610_p8  ;;  %s23_s23 = ssub.s32 %s1546_s12, %s1626_s21 }
  0x11   : > { %s1418_s26 = scalar_lea.hbm %s1841_s1, 7168 }
  0x12   : > { %p1621_p11 = pnand %p1305_p9, %p1843_p1  ;;  %p1419_p12 = scmp.ne.s32.totalorder %s1841_s1, %s1418_s26 }
  0x13   : > { %p1425_p5 = scmp.lt.u32.totalorder %s1418_s26, %s1841_s1 }
  0x14   : > { %p1420_p13 = pneg %p1621_p11 }
  0x16   : > { %p1421_p0 = pnand %p1420_p13, %p1419_p12 }
  0x18   : > { %p1422_p3 = pneg %p1421_p0 }
  0x1a   : > { %p1427_p7 = pnand %p1425_p5, %p1422_p3 }
  0x1c   : > { %1430 = shalt.err (!%p1427_p7)
}
  0x1d   : > { %s1431_s3 = scalar_lea.vmem %s1614_s19, 7168  ;;  %p1439_p2 = scmp.lt.s32.totalorder %s1614_s19, %s1614_s19 }
  0x1e   : > { %p1432_p9 = scmp.ne.s32.totalorder %s1614_s19, %s1431_s3  ;;  %p1440_p6 = scmp.lt.s32.totalorder %s1431_s3, %s1431_s3 }
  0x20   : > { %p1434_p10 = pnand %p1432_p9, %p1420_p13  ;;  %p1441_p4 = por %p1440_p6, %p1439_p2 }
  0x22   : > { %p1435_p1 = pneg %p1434_p10 }
  0x24   : > { %p1442_p8 = pnand %p1441_p4, %p1435_p1 }
  0x26   : > { %1445 = shalt.err (!%p1442_p8)
}
  0x27   : > { %s1549_s4 = smov 64   ;;  %s1550_s5 = smov 4  }
  0x28   : > { %1308 = dma.hbm_to_vmem [thread:$0]  (!%p1621_p11), %s1841_s1, 7168, %s1614_s19, [#allocation6], %s1549_s4, %s1549_s4, %s1550_s5  }
  0x29   : > { %p24_p2 = scmp.eq.s32.totalorder %s23_s23, 0  ;;  %p33_p1 = scmp.ne.s32.totalorder %s1542_s11, %s1538_s10 }
  0x2a   : > { %p34_p4 = scmp.eq.s32.totalorder %s1546_s12, 0  ;;  %p1318_p6 = scmp.lt.s32.totalorder %s1546_s12, 2 }
  0x2b   : > { %s1657_s8 = scalar_select %p24_p2, %s1542_s11, %s26_s22  }
  0x2c   : > { %p35_p8 = por %p34_p4, %p33_p1  ;;  %p1850_p10 = scmp.eq.s32.totalorder %s1591_s13, 1 }
  0x2d   : > { %s123_s18 = sand.u32 1, %s1542_s11   ;;  %s1028_s24 = sshll.u32 %s1546_s12, 6 }
  0x2e   : > { %p1661_p12 = por %p1850_p10, %p33_p1  ;;  %s1027_s25 = sshll.u32 %s123_s18, 2 }
  0x2f   : > { %s1670_s27 = scalar_lea.hbm %s1840_s0, %s1028_s24  ;;  %s127_s19 = scalar_lea.vmem [#allocation2], %s1027_s25 }
  0x30   : > { %s134_s22 = sshll.u32 %s127_s19, 4  ;;  %p1672_p11 = pnand %p1318_p6, %p35_p8  ;;  %s1676_s22 = int_to_ptr.vmem [resolvable:$true] %s134_s22 }
  0x31   : > { %s124_s28 = scalar_lea.sflag [#allocation3], %s123_s18  ;;  %s1446_s29 = scalar_lea.hbm %s1670_s27, 64 }
  0x32   : > { %p1447_p13 = scmp.ne.s32.totalorder %s1670_s27, %s1446_s29  ;;  %p1448_p0 = pneg %p1672_p11 }
  0x33   : > { %s1451_s4 = scalar_lea.hbm %s1840_s0, 128  ;;  %p1452_p7 = scmp.lt.u32.totalorder %s1670_s27, %s1840_s0 }
  0x34   : > { %p1449_p3 = pnand %p1448_p0, %p1447_p13  ;;  %p1453_p9 = scmp.lt.u32.totalorder %s1451_s4, %s1446_s29 }
  0x35   : > { %p1455_p1 = scmp.lt.u32.totalorder %s1446_s29, %s1670_s27 }
  0x36   : > { %p1450_p5 = pneg %p1449_p3  ;;  %p1454_p2 = por %p1453_p9, %p1452_p7 }
  0x38   : > { %p1456_p4 = por %p1455_p1, %p1454_p2 }
  0x3a   : > { %p1457_p6 = pnand %p1456_p4, %p1450_p5 }
  0x3c   : > { %1460 = shalt.err (!%p1457_p6)
}
  0x3d   : > { %s1461_s7 = scalar_lea.vmem %s1676_s22, 64  ;;  %s1551_s18 = smov [#allocation2]  }
  0x3e   : > { %p1462_p8 = scmp.ne.s32.totalorder %s1676_s22, %s1461_s7  ;;  %s1466_s24 = sshll.u32 %s1551_s18, 4  ;;  %s1467_s24 = int_to_ptr.vmem [resolvable:$false] %s1466_s24 }
  0x3f   : > { %s1468_s25 = scalar_lea.vmem %s1467_s24, 128  ;;  %p1469_p3 = scmp.lt.s32.totalorder %s1676_s22, %s1467_s24 }
  0x40   : > { %p1464_p10 = pnand %p1462_p8, %p1448_p0  ;;  %p1470_p7 = scmp.lt.s32.totalorder %s1468_s25, %s1461_s7 }
  0x42   : > { %p1465_p13 = pneg %p1464_p10  ;;  %p1471_p9 = por %p1470_p7, %p1469_p3 }
  0x44   : > { %p1472_p2 = pnand %p1471_p9, %p1465_p13 }
  0x46   : > { %1475 = shalt.err (!%p1472_p2)
}
  0x47   : > { %1312 = dma.hbm_to_vmem [thread:$0]  (!%p1672_p11), %s1670_s27, 64, %s1676_s22, %s124_s28  }
  0x48   : > { %p1853_p5 = scmp.ne.s32.totalorder %s1848_s17, 0 }
  0x49   : > { %s1706_s20 = sand.u32 (!%p1853_p5), 1, %s1538_s10   ;;  %p1854_p0 = scmp.ne.s32.totalorder (!%p1853_p5), %s1846_s15, 0 }
  0x4a   : > { %143 = sbr.rel (%p1853_p5) target bundleno = 1667 (0x683), region = 28  ;;  %s1030_s26 = sshll.u32 (!%p1853_p5), %s1706_s20, 2 }
  0x4b   : > { %s146_s19 = scalar_lea.sflag (!%p1853_p5), [#allocation3], %s1706_s20  ;;  %s1710_s29 = scalar_lea.vmem (!%p1853_p5), [#allocation2], %s1030_s26 }
  0x51   : > { %1521 = dma.done.wait (%p1854_p0), %s146_s19, 64  }
  0x52   : > { %1523 = vsyncadd (%p1854_p0), %s146_s19, 4294967232  ;;  %p1855_p11 = scmp.eq.s32.totalorder %s1591_s13, 0 }
  0x54   : > { %1525 = dma.done.wait (%p1855_p11), [#allocation6], 7168   ;;  %p1856_p1 = pmov %p1855_p11 }
  0x55   : > { %v1552_v0 = vmov 0.0   ;;  %vm1553_vm0 = vmmov 0   ;;  %v1358_v1 = vld [vmem:[#allocation5] sm:$0xff]   ;;  %v1359_v2 = vld [vmem:[#allocation5 + $0x8] sm:$0xff]   ;;  %v1360_v3 = vld [vmem:[#allocation5 + $0x10] sm:$0xff]   ;;  %s1032_s15 = sshll.u32 %s1706_s20, 3 }
  0x56   : > { %1527 = vsyncadd (%p1856_p1), [#allocation6], 4294960128  ;;  %1157 = vmatprep.subr.bf16.mxu0 %v1552_v0  ;;  %1173 = vmatprep.mubr.msk.bf16.mxu0 %vm1553_vm0, %v1552_v0  ;;  %v1366_v4 = vld [vmem:[#allocation5 + $0x40] sm:$0xff]   ;;  %v1361_v5 = vld [vmem:[#allocation5 + $0x18] sm:$0xff]   ;;  %s1091_s17 = sshll.u32 %s1591_s13, 7  ;;  %s173_s27 = scalar_lea.vmem [#allocation7], %s1032_s15 }
  0x57   : > { %1177 = vmatprep.subr.bf16.mxu1 %v1552_v0  ;;  %1193 = vmatprep.mubr.msk.bf16.mxu1 %vm1553_vm0, %v1552_v0  ;;  %v1367_v6 = vld [vmem:[#allocation5 + $0x48] sm:$0xff]   ;;  %v1362_v7 = vld [vmem:[#allocation5 + $0x20] sm:$0xff]   ;;  %v1368_v8 = vld [vmem:[#allocation5 + $0x50] sm:$0xff]   ;;  %s943_s22 = sshll.u32 %s173_s27, 4  ;;  %s1796_s30 = scalar_lea.hbm %s1842_s2, %s1091_s17  ;;  %s1798_s22 = int_to_ptr.vmem [resolvable:$true] %s943_s22 }
  0x58   : > { %1158 = vmatpush3.bf16.msra.mxu0 %v1358_v1  ;;  %1178 = vmatpush3.bf16.msra.mxu1 %v1366_v4  ;;  %v1363_v9 = vld [vmem:[#allocation5 + $0x28] sm:$0xff]   ;;  %v1369_v10 = vld [vmem:[#allocation5 + $0x58] sm:$0xff]   ;;  %v1364_v11 = vld [vmem:[#allocation5 + $0x30] sm:$0xff]   ;;  %s930_s3 = scalar_lea.sflag [#allocation4], %s1706_s20  ;;  %s1476_s4 = scalar_lea.vmem %s1798_s22, 128 }
  0x59   : > { %1159 = vmatprep.subr.bf16.mxu0 %v1552_v0  ;;  %1179 = vmatprep.subr.bf16.mxu1 %v1552_v0  ;;  %v1370_v12 = vld [vmem:[#allocation5 + $0x60] sm:$0xff]   ;;  %v1365_v13 = vld [vmem:[#allocation5 + $0x38] sm:$0xff]   ;;  %v1371_v14 = vld [vmem:[#allocation5 + $0x68] sm:$0xff]   ;;  %p1477_p4 = scmp.ne.s32.totalorder %s1798_s22, %s1476_s4  ;;  %s1554_s13 = smov [#allocation7]  }
  0x5a   : > { %v175_v15 = vld [vmem:[%s1710_s29] sm:$0xf]  ;;  %v1372_v16 = vld [vmem:[#allocation5 + $0x70] sm:$0xff]   ;;  %v1374_v18 = vld [vmem:[#allocation5 + $0x80] sm:$0xff]   ;;  %s1480_s5 = sshll.u32 %s1554_s13, 4  ;;  %s1481_s5 = int_to_ptr.vmem [resolvable:$false] %s1480_s5 }
  0x5b   : > { %v1373_v17 = vld [vmem:[#allocation5 + $0x78] sm:$0xff]   ;;  %v1375_v19 = vld [vmem:[#allocation5 + $0x88] sm:$0xff]   ;;  %v1376_v20 = vld [vmem:[#allocation5 + $0x90] sm:$0xff]   ;;  %p1478_p6 = pnand %p1477_p4, %p1661_p12  ;;  %s1482_s6 = scalar_lea.vmem %s1481_s5, 256 }
  0x5c   : > { %1160 = vmatpush3.bf16.msra.mxu0 %v1359_v2  ;;  %1180 = vmatpush3.bf16.msra.mxu1 %v1367_v6  ;;  %v1377_v21 = vld [vmem:[#allocation5 + $0x98] sm:$0xff]   ;;  %v1378_v22 = vld [vmem:[#allocation5 + $0xa0] sm:$0xff]   ;;  %v1379_v23 = vld [vmem:[#allocation5 + $0xa8] sm:$0xff]   ;;  %p1483_p10 = scmp.lt.s32.totalorder %s1798_s22, %s1481_s5  ;;  %p1484_p13 = scmp.lt.s32.totalorder %s1482_s6, %s1476_s4 }
  0x5d   : > { %1161 = vmatprep.subr.bf16.mxu0 %v1552_v0  ;;  %1181 = vmatprep.subr.bf16.mxu1 %v1552_v0  ;;  %v1380_v24 = vld [vmem:[#allocation5 + $0xb0] sm:$0xff]   ;;  %v1381_v31 = vld [vmem:[#allocation5 + $0xb8] sm:$0xff]   ;;  %v1382_v32 = vld [vmem:[#allocation5 + $0xc0] sm:$0xff]   ;;  %p1479_p8 = pneg %p1478_p6 }
  0x5e   : > { %v1383_v33 = vld [vmem:[#allocation5 + $0xc8] sm:$0xff]   ;;  %v1384_v34 = vld [vmem:[#allocation5 + $0xd0] sm:$0xff]   ;;  %v1385_v35 = vld [vmem:[#allocation5 + $0xd8] sm:$0xff]   ;;  %p1485_p3 = por %p1484_p13, %p1483_p10 }
  0x5f   : > { %v1386_v36 = vld [vmem:[#allocation5 + $0xe0] sm:$0xff]   ;;  %v1387_v37 = vld [vmem:[#allocation5 + $0xe8] sm:$0xff]   ;;  %v1388_v38 = vld [vmem:[#allocation5 + $0xf0] sm:$0xff]  }
  0x60   : > { %1162 = vmatpush3.bf16.msra.mxu0 %v1360_v3  ;;  %1182 = vmatpush3.bf16.msra.mxu1 %v1368_v8  ;;  %v1389_v45 = vld [vmem:[#allocation5 + $0xf8] sm:$0xff]   ;;  %v1390_v46 = vld [vmem:[#allocation5 + $0x100] sm:$0xff]   ;;  %v1391_v47 = vld [vmem:[#allocation5 + $0x108] sm:$0xff]   ;;  %p1486_p7 = pnand %p1485_p3, %p1479_p8 }
  0x61   : > { %1163 = vmatprep.subr.bf16.mxu0 %v1552_v0  ;;  %1183 = vmatprep.subr.bf16.mxu1 %v1552_v0  ;;  %v1392_v48 = vld [vmem:[#allocation5 + $0x110] sm:$0xff]   ;;  %v1393_v49 = vld [vmem:[#allocation5 + $0x118] sm:$0xff]   ;;  %v1394_v50 = vld [vmem:[#allocation5 + $0x120] sm:$0xff]  }
  0x62   : > { %v1395_v51 = vld [vmem:[#allocation5 + $0x128] sm:$0xff]   ;;  %v1396_v52 = vld [vmem:[#allocation5 + $0x130] sm:$0xff]   ;;  %v1397_v59 = vld [vmem:[#allocation5 + $0x138] sm:$0xff]  }
  0x63   : > { %v1398_v60 = vld [vmem:[#allocation5 + $0x140] sm:$0xff]   ;;  %v1399_v61 = vld [vmem:[#allocation5 + $0x148] sm:$0xff]   ;;  %v1400_v62 = vld [vmem:[#allocation5 + $0x150] sm:$0xff]  }
  0x64   : > { %1164 = vmatpush3.bf16.msra.mxu0 %v1361_v5  ;;  %1184 = vmatpush3.bf16.msra.mxu1 %v1369_v10  ;;  %v1401_v63 = vld [vmem:[#allocation5 + $0x158] sm:$0xff]   ;;  %v1402_v1 = vld [vmem:[#allocation5 + $0x160] sm:$0xff]   ;;  %v1403_v2 = vld [vmem:[#allocation5 + $0x168] sm:$0xff]  }
  0x65   : > { %1165 = vmatprep.subr.bf16.mxu0 %v1552_v0  ;;  %1185 = vmatprep.subr.bf16.mxu1 %v1552_v0  ;;  %v1404_v3 = vld [vmem:[#allocation5 + $0x170] sm:$0xff]   ;;  %v1405_v10 = vld [vmem:[#allocation5 + $0x178] sm:$0xff]  }
  0x68   : > { %1166 = vmatpush3.bf16.msra.mxu0 %v1362_v7  ;;  %1186 = vmatpush3.bf16.msra.mxu1 %v1370_v12  ;;  %v1407_v12 = vld [vmem:[#allocation5 + $0x188] sm:$0xff]  }
  0x69   : > { %1167 = vmatprep.subr.bf16.mxu0 %v1552_v0  ;;  %1187 = vmatprep.subr.bf16.mxu1 %v1552_v0 }
  0x6c   : > { %1168 = vmatpush3.bf16.msra.mxu0 %v1363_v9  ;;  %1188 = vmatpush3.bf16.msra.mxu1 %v1371_v14  ;;  %v1409_v14 = vld [vmem:[#allocation5 + $0x198] sm:$0xff]  }
  0x6d   : > { %1169 = vmatprep.subr.bf16.mxu0 %v1552_v0  ;;  %1189 = vmatprep.subr.bf16.mxu1 %v1552_v0 }
  0x70   : > { %1170 = vmatpush3.bf16.msra.mxu0 %v1364_v11  ;;  %1190 = vmatpush3.bf16.msra.mxu1 %v1372_v16  ;;  %v1406_v11 = vld [vmem:[#allocation5 + $0x180] sm:$0xff]   ;;  %v1411_v16 = vld [vmem:[#allocation5 + $0x1a8] sm:$0xff]  }
  0x71   : > { %1171 = vmatprep.subr.bf16.mxu0 %v1552_v0  ;;  %1191 = vmatprep.subr.bf16.mxu1 %v1552_v0 }
  0x74   : > { %1172 = vmatpush3.bf16.msra.mxu0 %v1365_v13  ;;  %1192 = vmatpush3.bf16.msra.mxu1 %v1373_v17  ;;  %v1408_v13 = vld [vmem:[#allocation5 + $0x190] sm:$0xff]  }
  0x75   : > { %1197 = vmatprep.subr.bf16.mxu0 %v1552_v0  ;;  %1217 = vmatprep.subr.bf16.mxu1 %v1552_v0  ;;  %v1412_v17 = vld [vmem:[#allocation5 + $0x1b0] sm:$0xff]  }
  0x77   : > { %1174 = vmatmul.mubr.bf16.vlgmr.msra.gmra.mrb[0].mxu0 %v175_v15  ;;  %v1410_v15 = vld [vmem:[#allocation5 + $0x1a0] sm:$0xff]  }
  0x78   : > { %1213 = vmatprep.mubr.msk.bf16.mxu0 %vm1553_vm0, %v1552_v0  ;;  %1198 = vmatpush3.bf16.msra.mxu0 %v1374_v18 }
  0x79   : > { %1199 = vmatprep.subr.bf16.mxu0 %v1552_v0 }
  0x7c   : > { %1200 = vmatpush3.bf16.msra.mxu0 %v1375_v19 }
  0x7d   : > { %1201 = vmatprep.subr.bf16.mxu0 %v1552_v0 }
  0x80   : > { %1202 = vmatpush3.bf16.msra.mxu0 %v1376_v20 }
  0x81   : > { %1203 = vmatprep.subr.bf16.mxu0 %v1552_v0 }
  0x84   : > { %1204 = vmatpush3.bf16.msra.mxu0 %v1377_v21 }
  0x85   : > { %1205 = vmatprep.subr.bf16.mxu0 %v1552_v0 }
  0x88   : > { %1206 = vmatpush3.bf16.msra.mxu0 %v1378_v22 }
  0x89   : > { %1207 = vmatprep.subr.bf16.mxu0 %v1552_v0 }
  0x8c   : > { %1208 = vmatpush3.bf16.msra.mxu0 %v1379_v23 }
  0x8d   : > { %1209 = vmatprep.subr.bf16.mxu0 %v1552_v0 }
  0x90   : > { %1210 = vmatpush3.bf16.msra.mxu0 %v1380_v24  ;;  %v1413_v24 = vld [vmem:[#allocation5 + $0x1b8] sm:$0xff]  }
  0x91   : > { %1211 = vmatprep.subr.bf16.mxu0 %v1552_v0 }
  0x94   : > { %1212 = vmatpush3.bf16.msra.mxu0 %v1381_v31 }
  0x95   : > { %1237 = vmatprep.subr.bf16.mxu0 %v1552_v0 }
 0x14a   : > { %v274_v25 = vpop.f32.mrb[0].mxu0 }
 0x14b   : > { %v280_v26 = vmax.f32 %v274_v25, 0.0  ;;  %v1175_v27 = vpop.f32.mrb[1].mxu0 }
 0x14c   : > { %v277_v28 = vpop.f32.mrb[2].mxu0 }
 0x14d   : > { %v281_v29 = vpack.c.bf16 %v280_v26, %v280_v26  ;;  %v1176_v30 = vpop.f32.mrb[3].mxu0 }
 0x14f   : > { %1194 = vmatmul.mubr.bf16.vlgmr.msra.gmra.mrb[0].mxu1 %v281_v29 }
 0x150   : > { %1233 = vmatprep.mubr.msk.bf16.mxu1 %vm1553_vm0, %v1552_v0  ;;  %1218 = vmatpush3.bf16.msra.mxu1 %v1382_v32 }
 0x151   : > { %1219 = vmatprep.subr.bf16.mxu1 %v1552_v0 }
 0x154   : > { %1220 = vmatpush3.bf16.msra.mxu1 %v1383_v33 }
 0x155   : > { %1221 = vmatprep.subr.bf16.mxu1 %v1552_v0 }
 0x158   : > { %1222 = vmatpush3.bf16.msra.mxu1 %v1384_v34 }
 0x159   : > { %1223 = vmatprep.subr.bf16.mxu1 %v1552_v0 }
 0x15c   : > { %1224 = vmatpush3.bf16.msra.mxu1 %v1385_v35 }
 0x15d   : > { %1225 = vmatprep.subr.bf16.mxu1 %v1552_v0 }
 0x160   : > { %1226 = vmatpush3.bf16.msra.mxu1 %v1386_v36 }
 0x161   : > { %1227 = vmatprep.subr.bf16.mxu1 %v1552_v0 }
 0x164   : > { %1228 = vmatpush3.bf16.msra.mxu1 %v1387_v37 }
 0x165   : > { %1229 = vmatprep.subr.bf16.mxu1 %v1552_v0 }
 0x168   : > { %1230 = vmatpush3.bf16.msra.mxu1 %v1388_v38 }
 0x169   : > { %1231 = vmatprep.subr.bf16.mxu1 %v1552_v0 }
 0x16c   : > { %1232 = vmatpush3.bf16.msra.mxu1 %v1389_v45 }
 0x16d   : > { %1257 = vmatprep.subr.bf16.mxu1 %v1552_v0 }
 0x222   : > { %v381_v39 = vpop.f32.mrb[0].mxu1 }
 0x223   : > { %v387_v40 = vmax.f32 %v381_v39, 0.0  ;;  %v1195_v41 = vpop.f32.mrb[1].mxu1 }
 0x224   : > { %v384_v42 = vpop.f32.mrb[2].mxu1 }
 0x225   : > { %v388_v43 = vpack.c.bf16 %v387_v40, %v387_v40  ;;  %v1196_v44 = vpop.f32.mrb[3].mxu1 }
 0x227   : > { %1214 = vmatmul.mubr.bf16.vlgmr.msra.gmra.mrb[4].mxu0 %v388_v43 }
 0x228   : > { %1253 = vmatprep.mubr.msk.bf16.mxu0 %vm1553_vm0, %v1552_v0  ;;  %1238 = vmatpush3.bf16.msra.mxu0 %v1390_v46 }
 0x229   : > { %1239 = vmatprep.subr.bf16.mxu0 %v1552_v0 }
 0x22c   : > { %1240 = vmatpush3.bf16.msra.mxu0 %v1391_v47 }
 0x22d   : > { %1241 = vmatprep.subr.bf16.mxu0 %v1552_v0 }
 0x230   : > { %1242 = vmatpush3.bf16.msra.mxu0 %v1392_v48 }
 0x231   : > { %1243 = vmatprep.subr.bf16.mxu0 %v1552_v0 }
 0x234   : > { %1244 = vmatpush3.bf16.msra.mxu0 %v1393_v49 }
 0x235   : > { %1245 = vmatprep.subr.bf16.mxu0 %v1552_v0 }
 0x238   : > { %1246 = vmatpush3.bf16.msra.mxu0 %v1394_v50 }
 0x239   : > { %1247 = vmatprep.subr.bf16.mxu0 %v1552_v0 }
 0x23c   : > { %1248 = vmatpush3.bf16.msra.mxu0 %v1395_v51 }
 0x23d   : > { %1249 = vmatprep.subr.bf16.mxu0 %v1552_v0 }
 0x240   : > { %1250 = vmatpush3.bf16.msra.mxu0 %v1396_v52 }
 0x241   : > { %1251 = vmatprep.subr.bf16.mxu0 %v1552_v0 }
 0x244   : > { %1252 = vmatpush3.bf16.msra.mxu0 %v1397_v59 }
 0x245   : > { %1277 = vmatprep.subr.bf16.mxu0 %v1552_v0 }
 0x2fa   : > { %v488_v53 = vpop.f32.mrb[4].mxu0 }
 0x2fb   : > { %v494_v54 = vmax.f32 %v488_v53, 0.0  ;;  %v1215_v55 = vpop.f32.mrb[5].mxu0 }
 0x2fc   : > { %v491_v56 = vpop.f32.mrb[6].mxu0 }
 0x2fd   : > { %v495_v57 = vpack.c.bf16 %v494_v54, %v494_v54  ;;  %v1216_v58 = vpop.f32.mrb[7].mxu0 }
 0x2ff   : > { %1234 = vmatmul.mubr.bf16.vlgmr.msra.gmra.mrb[4].mxu1 %v495_v57 }
 0x300   : > { %1273 = vmatprep.mubr.msk.bf16.mxu1 %vm1553_vm0, %v1552_v0  ;;  %1258 = vmatpush3.bf16.msra.mxu1 %v1398_v60 }
 0x301   : > { %1259 = vmatprep.subr.bf16.mxu1 %v1552_v0 }
 0x304   : > { %1260 = vmatpush3.bf16.msra.mxu1 %v1399_v61 }
 0x305   : > { %1261 = vmatprep.subr.bf16.mxu1 %v1552_v0 }
 0x308   : > { %1262 = vmatpush3.bf16.msra.mxu1 %v1400_v62 }
 0x309   : > { %1263 = vmatprep.subr.bf16.mxu1 %v1552_v0 }
 0x30c   : > { %1264 = vmatpush3.bf16.msra.mxu1 %v1401_v63 }
 0x30d   : > { %1265 = vmatprep.subr.bf16.mxu1 %v1552_v0 }
 0x310   : > { %1266 = vmatpush3.bf16.msra.mxu1 %v1402_v1 }
 0x311   : > { %1267 = vmatprep.subr.bf16.mxu1 %v1552_v0 }
 0x314   : > { %1268 = vmatpush3.bf16.msra.mxu1 %v1403_v2 }
 0x315   : > { %1269 = vmatprep.subr.bf16.mxu1 %v1552_v0 }
 0x318   : > { %1270 = vmatpush3.bf16.msra.mxu1 %v1404_v3 }
 0x319   : > { %1271 = vmatprep.subr.bf16.mxu1 %v1552_v0 }
 0x31c   : > { %1272 = vmatpush3.bf16.msra.mxu1 %v1405_v10 }
 0x3d2   : > { %v595_v4 = vpop.f32.mrb[4].mxu1 }
 0x3d3   : > { %v601_v5 = vmax.f32 %v595_v4, 0.0  ;;  %v1235_v6 = vpop.f32.mrb[5].mxu1 }
 0x3d4   : > { %v598_v7 = vpop.f32.mrb[6].mxu1 }
 0x3d5   : > { %v602_v8 = vpack.c.bf16 %v601_v5, %v601_v5  ;;  %v1236_v9 = vpop.f32.mrb[7].mxu1 }
 0x3d7   : > { %1254 = vmatmul.mubr.bf16.vlgmr.msra.gmra.mrb[8].mxu0 %v602_v8 }
 0x3d8   : > { %1293 = vmatprep.mubr.msk.bf16.mxu0 %vm1553_vm0, %v1552_v0  ;;  %1278 = vmatpush3.bf16.msra.mxu0 %v1406_v11 }
 0x3d9   : > { %1279 = vmatprep.subr.bf16.mxu0 %v1552_v0 }
 0x3dc   : > { %1280 = vmatpush3.bf16.msra.mxu0 %v1407_v12 }
 0x3dd   : > { %1281 = vmatprep.subr.bf16.mxu0 %v1552_v0 }
 0x3e0   : > { %1282 = vmatpush3.bf16.msra.mxu0 %v1408_v13 }
 0x3e1   : > { %1283 = vmatprep.subr.bf16.mxu0 %v1552_v0 }
 0x3e4   : > { %1284 = vmatpush3.bf16.msra.mxu0 %v1409_v14 }
 0x3e5   : > { %1285 = vmatprep.subr.bf16.mxu0 %v1552_v0 }
 0x3e8   : > { %1286 = vmatpush3.bf16.msra.mxu0 %v1410_v15 }
 0x3e9   : > { %1287 = vmatprep.subr.bf16.mxu0 %v1552_v0 }
 0x3ec   : > { %1288 = vmatpush3.bf16.msra.mxu0 %v1411_v16 }
 0x3ed   : > { %1289 = vmatprep.subr.bf16.mxu0 %v1552_v0 }
 0x3f0   : > { %1290 = vmatpush3.bf16.msra.mxu0 %v1412_v17 }
 0x3f1   : > { %1291 = vmatprep.subr.bf16.mxu0 %v1552_v0 }
 0x3f4   : > { %1292 = vmatpush3.bf16.msra.mxu0 %v1413_v24 }
 0x4aa   : > { %v702_v18 = vpop.f32.mrb[8].mxu0 }
 0x4ab   : > { %v708_v19 = vmax.f32 %v702_v18, 0.0  ;;  %v1255_v20 = vpop.f32.mrb[9].mxu0 }
 0x4ac   : > { %v705_v21 = vpop.f32.mrb[10].mxu0 }
 0x4ad   : > { %v709_v22 = vpack.c.bf16 %v708_v19, %v708_v19  ;;  %v1256_v23 = vpop.f32.mrb[11].mxu0 }
 0x4af   : > { %1274 = vmatmul.mubr.bf16.vlgmr.msra.gmra.mrb[8].mxu1 %v709_v22 }
 0x582   : > { %v809_v25 = vpop.f32.mrb[8].mxu1 }
 0x583   : > { %v815_v26 = vmax.f32 %v809_v25, 0.0  ;;  %v1275_v27 = vpop.f32.mrb[9].mxu1 }
 0x584   : > { %v812_v28 = vpop.f32.mrb[10].mxu1 }
 0x585   : > { %v816_v29 = vpack.c.bf16 %v815_v26, %v815_v26  ;;  %v1276_v30 = vpop.f32.mrb[11].mxu1 }
 0x587   : > { %1294 = vmatmul.mubr.bf16.vlgmr.msra.gmra.mrb[12].mxu0 %v816_v29 }
 0x65a   : > { %v916_v31 = vpop.f32.mrb[12].mxu0 }
 0x65b   : > { %v1089_v0 = vmul.f32 -1.442695, %v916_v31  ;;  %v1295_v32 = vpop.f32.mrb[13].mxu0 }
 0x65c   : > { %v919_v33 = vpop.f32.mrb[14].mxu0 }
 0x65d   : > { %1414 = vpow2.f32 %v1089_v0  ;;  %v1296_v34 = vpop.f32.mrb[15].mxu0 }
 0x667   : > { %v1415_v35 = vpop.eup %1414 }
 0x668   : > { %v925_v36 = vadd.f32 1.0, %v1415_v35 }
 0x66a   : > { %1416 = vrcp.f32 %v925_v36 }
 0x674   : > { %v1417_v37 = vpop.eup %1416 }
 0x675   : > { %928 = vst [vmem:[%s173_s27] sm:$0xff] %v1417_v37 }
 0x676   : > { %1489 = shalt.err (!%p1486_p7)
}
 0x677   : > { %s1490_s7 = scalar_lea.hbm %s1796_s30, 128  ;;  %s1494_s25 = scalar_lea.hbm %s1842_s2, 256 }
 0x678   : > { %p1491_p9 = scmp.ne.s32.totalorder %s1796_s30, %s1490_s7  ;;  %p1495_p0 = scmp.lt.u32.totalorder %s1796_s30, %s1842_s2 }
 0x679   : > { %p1496_p11 = scmp.lt.u32.totalorder %s1494_s25, %s1490_s7  ;;  %p1498_p4 = scmp.lt.u32.totalorder %s1490_s7, %s1796_s30 }
 0x67a   : > { %p1492_p2 = pnand %p1491_p9, %p1661_p12 }
 0x67b   : > { %p1497_p1 = por %p1496_p11, %p1495_p0 }
 0x67c   : > { %p1493_p5 = pneg %p1492_p2 }
 0x67d   : > { %p1499_p6 = por %p1498_p4, %p1497_p1 }
 0x67f   : > { %p1500_p8 = pnand %p1499_p6, %p1493_p5 }
 0x681   : > { %1503 = shalt.err (!%p1500_p8)
}
 0x682   : > { %1303 = dma.vmem_to_hbm [thread:$0]  (%p1661_p12), %s1798_s22, 128, %s1796_s30, %s930_s3  }
 0x683 PF: > { %s955_s19 = sand.u32 1, %s1534_s9   ;;  %p1857_p10 = scmp.ne.s32.totalorder %s1847_s16, 0 }
 0x684   : > { %p1858_p13 = scmp.ge.s32.totalorder %s1546_s12, 2  ;;  %s956_s29 = scalar_lea.sflag [#allocation4], %s955_s19 }
 0x686   : > { %p1314_p3 = pnand %p1858_p13, %p1857_p10 }
 0x688   : > { %1529 = dma.done.wait (!%p1314_p3), %s956_s29, 128  }
 0x689   : > { %1531 = vsyncadd (!%p1314_p3), %s956_s29, 4294967168  ;;  %p16_p7 = scmp.ge.s32.totalorder %s1626_s21, 4   ;;  %s1859_s9 = smov %s1538_s10 }
 0x68a   : > { %s1860_s10 = smov %s1542_s11  ;;  %s1861_s11 = smov %s1657_s8 }
 0x68b   : > { %s1862_s12 = smov %s1626_s21  ;;  %18 = sbr.rel (!%p16_p7) target bundleno = 6 (0x6), region = 83 }
 0x692   :  { %961 = vsyncpa [#allocation3], 1 }
 0x693   :  { %963 = vsyncpa [#allocation3 + $0x1], 1 }
 0x694   :  { %964 = vsyncpa [#allocation6], 1 }
 0x695   :  { %965 = vsyncpa [#allocation4], 1 }
 0x696   :  { %967 = vsyncpa [#allocation4 + $0x1], 1 }

</bundles_post_ra>
